<compile_context>
chip_gen: v5e
topology: v5e:2x2
jax: 0.10.0
libtpu: 0.0.40
codegen_flags: <defaults>
</compile_context>

<pallas_src>
import functools

import jax
import jax.numpy as jnp
from jax import lax
from jax.experimental import pallas as pl
from jax.experimental.pallas import tpu as pltpu


def _round_up(x, m):
    return ((x + m - 1) // m) * m


def _adjacency_kernel(x_ref, y_ref,
                      w_in_x_ref, w_in_y_ref, b_in_ref,
                      w_blk_ref, b_blk_ref,
                      w_out_ref, b_out_ref,
                      o_ref, *, out_valid):
    neg_slope = jnp.float32(0.01)

    # ---- input_layer (LayerLeaky): cat(x, y) @ W_in == x @ W_in_x + y @ W_in_y ----
    h = jnp.dot(x_ref[...], w_in_x_ref[...], preferred_element_type=jnp.float32)
    h = h + jnp.dot(y_ref[...], w_in_y_ref[...], preferred_element_type=jnp.float32)
    h = h + b_in_ref[...]
    h = jnp.where(h > 0, h, neg_slope * h)

    # ---- BlockResidualSmall (num_blocks = 1), dropout = identity at inference ----
    r = jnp.dot(h.astype(jnp.bfloat16), w_blk_ref[...],
                preferred_element_type=jnp.float32)
    r = r + b_blk_ref[...]
    r = jnp.where(r > 0, r, neg_slope * r)
    h = h + r

    # ---- output_layer: Linear (lane-padded weights -> full-width MXU tile) ----
    logits = jnp.dot(h.astype(jnp.bfloat16), w_out_ref[...],
                     preferred_element_type=jnp.float32)
    logits = logits + b_out_ref[...]

    # ---- mask padded lanes, softmax over feature axis (torch dim=1) ----
    col = lax.broadcasted_iota(jnp.int32, logits.shape, 1)
    logits = jnp.where(col < out_valid, logits, jnp.float32(-1e30))
    m = jnp.max(logits, axis=1, keepdims=True)
    e = jnp.exp(logits - m)
    denom = jnp.sum(e, axis=1, keepdims=True)
    probs = e * pl.reciprocal(denom, approx=True)

    # Store only the real classes: narrow, contiguous HBM writeback.
    o_ref[...] = probs[:, :out_valid].astype(o_ref.dtype)


def init_params(key, input_size, hidden_size, output_size, scale=0.05):
    """Unpadded, computation-layout params (weights are [in, out])."""
    ks = jax.random.split(key, 7)
    return {
        "w_in_x": scale * jax.random.normal(ks[0], (input_size, hidden_size), jnp.float32),
        "w_in_y": scale * jax.random.normal(ks[1], (input_size, hidden_size), jnp.float32),
        "b_in":   scale * jax.random.normal(ks[2], (hidden_size,), jnp.float32),
        "w_blk":  scale * jax.random.normal(ks[3], (hidden_size, hidden_size), jnp.float32),
        "b_blk":  scale * jax.random.normal(ks[4], (hidden_size,), jnp.float32),
        "w_out":  scale * jax.random.normal(ks[5], (hidden_size, output_size), jnp.float32),
        "b_out":  scale * jax.random.normal(ks[6], (output_size,), jnp.float32),
    }


def pad_params(params, lane=128):
    """Zero-pad hidden/output feature axes to lane multiples; cast weights to bf16."""
    din = params["w_in_x"].shape[0]
    hid = params["w_blk"].shape[0]
    out = params["w_out"].shape[1]
    hp = _round_up(hid, lane)
    op = _round_up(out, lane)

    def pad_w(a, rows, cols):
        z = jnp.zeros((rows, cols), jnp.bfloat16)
        return z.at[: a.shape[0], : a.shape[1]].set(a.astype(jnp.bfloat16))

    def pad_b(b, cols):
        z = jnp.zeros((1, cols), jnp.float32)
        return z.at[0, : b.shape[0]].set(b)

    return {
        "w_in_x": pad_w(params["w_in_x"], din, hp),
        "w_in_y": pad_w(params["w_in_y"], din, hp),
        "b_in":   pad_b(params["b_in"], hp),
        "w_blk":  pad_w(params["w_blk"], hp, hp),
        "b_blk":  pad_b(params["b_blk"], hp),
        "w_out":  pad_w(params["w_out"], hp, op),
        "b_out":  pad_b(params["b_out"], op),
        "hidden_pad": hp,
        "out_pad": op,
        "out_valid": out,
    }


def adjacency_detector_forward(x, y, padded, *, tile_b=1024):
    """x, y: [B, input_size] f32. Returns softmax probabilities [B, output_size] f32."""
    B, din = x.shape
    hp, op, out_valid = padded["hidden_pad"], padded["out_pad"], padded["out_valid"]

    # Pick a batch tile: large for per-step overhead, but cap padding waste.
    b8 = _round_up(B, 8)
    tile_b = min(tile_b, b8)
    while tile_b > 256 and (_round_up(B, tile_b) - B) > tile_b // 2:
        tile_b //= 2
    b_pad = _round_up(B, tile_b)

    if b_pad != B:
        x = jnp.pad(x, ((0, b_pad - B), (0, 0)))
        y = jnp.pad(y, ((0, b_pad - B), (0, 0)))
    x = x.astype(jnp.bfloat16)
    y = y.astype(jnp.bfloat16)

    def batch_spec(feat):
        return pl.BlockSpec((tile_b, feat), lambda i: (i, 0))

    def const_spec(rows, cols):
        return pl.BlockSpec((rows, cols), lambda i: (0, 0))

    kernel = functools.partial(_adjacency_kernel, out_valid=out_valid)

    out = pl.pallas_call(
        kernel,
        out_shape=jax.ShapeDtypeStruct((b_pad, out_valid), jnp.float32),
        grid=(b_pad // tile_b,),
        in_specs=[
            batch_spec(din),            # x
            batch_spec(din),            # y
            const_spec(din, hp),        # w_in_x
            const_spec(din, hp),        # w_in_y
            const_spec(1, hp),          # b_in
            const_spec(hp, hp),         # w_blk
            const_spec(1, hp),          # b_blk
            const_spec(hp, op),         # w_out
            const_spec(1, op),          # b_out
        ],
        out_specs=pl.BlockSpec((tile_b, out_valid), lambda i: (i, 0)),
        compiler_params=pltpu.CompilerParams(
            dimension_semantics=("parallel",)),
    )(x, y,
      padded["w_in_x"], padded["w_in_y"], padded["b_in"],
      padded["w_blk"], padded["b_blk"],
      padded["w_out"], padded["b_out"])

    if b_pad != B:
        out = out[:B]
    return out


def reference_forward(x, y, params):
    """Pure-JAX f32 reference of the torch forward pass."""
    neg = 0.01
    h = x @ params["w_in_x"] + y @ params["w_in_y"] + params["b_in"]
    h = jnp.where(h > 0, h, neg * h)
    r = h @ params["w_blk"] + params["b_blk"]
    r = jnp.where(r > 0, r, neg * r)
    h = h + r
    logits = h @ params["w_out"] + params["b_out"]
    return jax.nn.softmax(logits, axis=1)


if __name__ == "__main__":
    # Small shapes consistent with the module's forward (defaults scaled down).
    B = 8
    input_size = 32
    hidden_size = 32
    output_size = 2

    key = jax.random.PRNGKey(0)
    kx, ky, kp = jax.random.split(key, 3)

    x = jax.random.normal(kx, (B, input_size), jnp.float32)
    y = jax.random.normal(ky, (B, input_size), jnp.float32)

    params = init_params(kp, input_size, hidden_size, output_size)
    padded = pad_params(params)

    out = adjacency_detector_forward(x, y, padded)
    out = jax.block_until_ready(out)

    ref = reference_forward(x, y, params)

    assert out.shape == (B, output_size)
    # Rows sum to ~1 (approx reciprocal + bf16 matmul inputs -> loose tolerance).
    assert jnp.allclose(jnp.sum(out, axis=1), 1.0, atol=1e-2)
    # Parity with the f32 reference.
    assert jnp.allclose(out, ref, atol=3e-2)

    print("KERNEL_OK")
</pallas_src>

<mosaic_0001>
module attributes {stable_mosaic.version = 11 : i64} {
  func.func @_adjacency_kernel(%arg0: i32, %arg1: memref<8x32xbf16, #tpu.memory_space<vmem>>, %arg2: memref<8x32xbf16, #tpu.memory_space<vmem>>, %arg3: memref<32x128xbf16, #tpu.memory_space<vmem>>, %arg4: memref<32x128xbf16, #tpu.memory_space<vmem>>, %arg5: memref<1x128xf32, #tpu.memory_space<vmem>>, %arg6: memref<128x128xbf16, #tpu.memory_space<vmem>>, %arg7: memref<1x128xf32, #tpu.memory_space<vmem>>, %arg8: memref<128x128xbf16, #tpu.memory_space<vmem>>, %arg9: memref<1x128xf32, #tpu.memory_space<vmem>>, %arg10: memref<8x2xf32, #tpu.memory_space<vmem>>) attributes {dimension_semantics = [#tpu.dimension_semantics<parallel>], iteration_bounds = array<i64: 1>, scalar_prefetch = 0 : i64, scratch_operands = 0 : i64, tpu.core_type = #tpu.core_type<tc>, window_params = [{transform_indices = @transform_0, window_bounds = array<i64: 8, 32>}, {transform_indices = @transform_1, window_bounds = array<i64: 8, 32>}, {pipeline_mode = #tpu.pipeline_mode<synchronous>, transform_indices = @transform_2, window_bounds = array<i64: 32, 128>}, {pipeline_mode = #tpu.pipeline_mode<synchronous>, transform_indices = @transform_3, window_bounds = array<i64: 32, 128>}, {pipeline_mode = #tpu.pipeline_mode<synchronous>, transform_indices = @transform_4, window_bounds = array<i64: 1, 128>}, {pipeline_mode = #tpu.pipeline_mode<synchronous>, transform_indices = @transform_5, window_bounds = array<i64: 128, 128>}, {pipeline_mode = #tpu.pipeline_mode<synchronous>, transform_indices = @transform_6, window_bounds = array<i64: 1, 128>}, {pipeline_mode = #tpu.pipeline_mode<synchronous>, transform_indices = @transform_7, window_bounds = array<i64: 128, 128>}, {pipeline_mode = #tpu.pipeline_mode<synchronous>, transform_indices = @transform_8, window_bounds = array<i64: 1, 128>}, {transform_indices = @transform_9, window_bounds = array<i64: 8, 2>}]} {
    %c0 = arith.constant 0 : index
    %c0_0 = arith.constant 0 : index
    %0 = vector.load %arg1[%c0, %c0_0] : memref<8x32xbf16, #tpu.memory_space<vmem>>, vector<8x32xbf16>
    %c0_1 = arith.constant 0 : index
    %c0_2 = arith.constant 0 : index
    %1 = vector.load %arg3[%c0_1, %c0_2] : memref<32x128xbf16, #tpu.memory_space<vmem>>, vector<32x128xbf16>
    %cst = arith.constant dense<0.000000e+00> : vector<8x128xf32>
    %2 = tpu.matmul %0, %1, %cst {dimension_numbers = #tpu.dot_dimension_numbers<[1], [0], [0], [1], [0, 0, 1, 1], [], []>} : vector<8x32xbf16>, vector<32x128xbf16>, vector<8x128xf32> -> vector<8x128xf32>
    %c0_3 = arith.constant 0 : index
    %c0_4 = arith.constant 0 : index
    %3 = vector.load %arg2[%c0_3, %c0_4] : memref<8x32xbf16, #tpu.memory_space<vmem>>, vector<8x32xbf16>
    %c0_5 = arith.constant 0 : index
    %c0_6 = arith.constant 0 : index
    %4 = vector.load %arg4[%c0_5, %c0_6] : memref<32x128xbf16, #tpu.memory_space<vmem>>, vector<32x128xbf16>
    %cst_7 = arith.constant dense<0.000000e+00> : vector<8x128xf32>
    %5 = tpu.matmul %3, %4, %cst_7 {dimension_numbers = #tpu.dot_dimension_numbers<[1], [0], [0], [1], [0, 0, 1, 1], [], []>} : vector<8x32xbf16>, vector<32x128xbf16>, vector<8x128xf32> -> vector<8x128xf32>
    %6 = arith.addf %2, %5 : vector<8x128xf32>
    %c0_8 = arith.constant 0 : index
    %c0_9 = arith.constant 0 : index
    %7 = vector.load %arg5[%c0_8, %c0_9] : memref<1x128xf32, #tpu.memory_space<vmem>>, vector<1x128xf32>
    %8 = vector.broadcast %7 : vector<1x128xf32> to vector<8x128xf32>
    %9 = arith.addf %6, %8 : vector<8x128xf32>
    %cst_10 = arith.constant 0.000000e+00 : f32
    %10 = vector.broadcast %cst_10 : f32 to vector<8x128xf32>
    %11 = arith.cmpf ogt, %9, %10 : vector<8x128xf32>
    %cst_11 = arith.constant 0.00999999977 : f32
    %12 = vector.broadcast %cst_11 : f32 to vector<8x128xf32>
    %13 = arith.mulf %12, %9 : vector<8x128xf32>
    %14 = arith.select %11, %9, %13 : vector<8x128xi1>, vector<8x128xf32>
    %15 = arith.truncf %14 : vector<8x128xf32> to vector<8x128xbf16>
    %c0_12 = arith.constant 0 : index
    %c0_13 = arith.constant 0 : index
    %16 = vector.load %arg6[%c0_12, %c0_13] : memref<128x128xbf16, #tpu.memory_space<vmem>>, vector<128x128xbf16>
    %cst_14 = arith.constant dense<0.000000e+00> : vector<8x128xf32>
    %17 = tpu.matmul %15, %16, %cst_14 {dimension_numbers = #tpu.dot_dimension_numbers<[1], [0], [0], [1], [0, 0, 1, 1], [], []>} : vector<8x128xbf16>, vector<128x128xbf16>, vector<8x128xf32> -> vector<8x128xf32>
    %c0_15 = arith.constant 0 : index
    %c0_16 = arith.constant 0 : index
    %18 = vector.load %arg7[%c0_15, %c0_16] : memref<1x128xf32, #tpu.memory_space<vmem>>, vector<1x128xf32>
    %19 = vector.broadcast %18 : vector<1x128xf32> to vector<8x128xf32>
    %20 = arith.addf %17, %19 : vector<8x128xf32>
    %cst_17 = arith.constant 0.000000e+00 : f32
    %21 = vector.broadcast %cst_17 : f32 to vector<8x128xf32>
    %22 = arith.cmpf ogt, %20, %21 : vector<8x128xf32>
    %cst_18 = arith.constant 0.00999999977 : f32
    %23 = vector.broadcast %cst_18 : f32 to vector<8x128xf32>
    %24 = arith.mulf %23, %20 : vector<8x128xf32>
    %25 = arith.select %22, %20, %24 : vector<8x128xi1>, vector<8x128xf32>
    %26 = arith.addf %14, %25 : vector<8x128xf32>
    %27 = arith.truncf %26 : vector<8x128xf32> to vector<8x128xbf16>
    %c0_19 = arith.constant 0 : index
    %c0_20 = arith.constant 0 : index
    %28 = vector.load %arg8[%c0_19, %c0_20] : memref<128x128xbf16, #tpu.memory_space<vmem>>, vector<128x128xbf16>
    %cst_21 = arith.constant dense<0.000000e+00> : vector<8x128xf32>
    %29 = tpu.matmul %27, %28, %cst_21 {dimension_numbers = #tpu.dot_dimension_numbers<[1], [0], [0], [1], [0, 0, 1, 1], [], []>} : vector<8x128xbf16>, vector<128x128xbf16>, vector<8x128xf32> -> vector<8x128xf32>
    %c0_22 = arith.constant 0 : index
    %c0_23 = arith.constant 0 : index
    %30 = vector.load %arg9[%c0_22, %c0_23] : memref<1x128xf32, #tpu.memory_space<vmem>>, vector<1x128xf32>
    %31 = vector.broadcast %30 : vector<1x128xf32> to vector<8x128xf32>
    %32 = arith.addf %29, %31 : vector<8x128xf32>
    %33 = tpu.iota {dimensions = array<i32: 1>} : vector<8x128xi32>
    %c2_i32 = arith.constant 2 : i32
    %34 = vector.broadcast %c2_i32 : i32 to vector<8x128xi32>
    %35 = arith.cmpi slt, %33, %34 : vector<8x128xi32>
    %cst_24 = arith.constant -1.000000e+30 : f32
    %36 = vector.broadcast %cst_24 : f32 to vector<8x128xf32>
    %37 = arith.select %35, %32, %36 : vector<8x128xi1>, vector<8x128xf32>
    %cst_25 = arith.constant dense<0xFF800000> : vector<8xf32>
    %38 = vector.multi_reduction <maximumf>, %37, %cst_25 [1] : vector<8x128xf32> to vector<8xf32>
    %39 = vector.shape_cast %38 : vector<8xf32> to vector<8x1xf32>
    %40 = vector.broadcast %39 : vector<8x1xf32> to vector<8x128xf32>
    %41 = arith.subf %37, %40 : vector<8x128xf32>
    %42 = math.exp %41 : vector<8x128xf32>
    %cst_26 = arith.constant dense<0.000000e+00> : vector<8xf32>
    %43 = vector.multi_reduction <add>, %42, %cst_26 [1] : vector<8x128xf32> to vector<8xf32>
    %44 = vector.shape_cast %43 : vector<8xf32> to vector<8x1xf32>
    %45 = tpu.reciprocal %44 {approx = true} : vector<8x1xf32> -> vector<8x1xf32>
    %46 = vector.broadcast %45 : vector<8x1xf32> to vector<8x128xf32>
    %47 = arith.mulf %42, %46 : vector<8x128xf32>
    %48 = vector.extract_strided_slice %47 {offsets = [0, 0], sizes = [8, 2], strides = [1, 1]} : vector<8x128xf32> to vector<8x2xf32>
    %c0_27 = arith.constant 0 : index
    %c0_28 = arith.constant 0 : index
    %49 = vector.load %arg10[%c0_27, %c0_28] : memref<8x2xf32, #tpu.memory_space<vmem>>, vector<8x2xf32>
    tpu.vector_store %arg10[%c0_27, %c0_28], %48 {strides = array<i32>} : memref<8x2xf32, #tpu.memory_space<vmem>>, vector<8x2xf32>,
    return
  }
  func.func @transform_0(%arg0: i32) -> (i32, i32) {
    %c0_i32 = arith.constant 0 : i32
    %c0_i32_0 = arith.constant 0 : i32
    return %arg0, %c0_i32 : i32, i32
  }
  func.func @transform_1(%arg0: i32) -> (i32, i32) {
    %c0_i32 = arith.constant 0 : i32
    %c0_i32_0 = arith.constant 0 : i32
    return %arg0, %c0_i32 : i32, i32
  }
  func.func @transform_2(%arg0: i32) -> (i32, i32) {
    %c0_i32 = arith.constant 0 : i32
    %c0_i32_0 = arith.constant 0 : i32
    %c0_i32_1 = arith.constant 0 : i32
    return %c0_i32, %c0_i32_0 : i32, i32
  }
  func.func @transform_3(%arg0: i32) -> (i32, i32) {
    %c0_i32 = arith.constant 0 : i32
    %c0_i32_0 = arith.constant 0 : i32
    %c0_i32_1 = arith.constant 0 : i32
    return %c0_i32, %c0_i32_0 : i32, i32
  }
  func.func @transform_4(%arg0: i32) -> (i32, i32) {
    %c0_i32 = arith.constant 0 : i32
    %c0_i32_0 = arith.constant 0 : i32
    %c0_i32_1 = arith.constant 0 : i32
    return %c0_i32, %c0_i32_0 : i32, i32
  }
  func.func @transform_5(%arg0: i32) -> (i32, i32) {
    %c0_i32 = arith.constant 0 : i32
    %c0_i32_0 = arith.constant 0 : i32
    %c0_i32_1 = arith.constant 0 : i32
    return %c0_i32, %c0_i32_0 : i32, i32
  }
  func.func @transform_6(%arg0: i32) -> (i32, i32) {
    %c0_i32 = arith.constant 0 : i32
    %c0_i32_0 = arith.constant 0 : i32
    %c0_i32_1 = arith.constant 0 : i32
    return %c0_i32, %c0_i32_0 : i32, i32
  }
  func.func @transform_7(%arg0: i32) -> (i32, i32) {
    %c0_i32 = arith.constant 0 : i32
    %c0_i32_0 = arith.constant 0 : i32
    %c0_i32_1 = arith.constant 0 : i32
    return %c0_i32, %c0_i32_0 : i32, i32
  }
  func.func @transform_8(%arg0: i32) -> (i32, i32) {
    %c0_i32 = arith.constant 0 : i32
    %c0_i32_0 = arith.constant 0 : i32
    %c0_i32_1 = arith.constant 0 : i32
    return %c0_i32, %c0_i32_0 : i32, i32
  }
  func.func @transform_9(%arg0: i32) -> (i32, i32) {
    %c0_i32 = arith.constant 0 : i32
    %c0_i32_0 = arith.constant 0 : i32
    return %arg0, %c0_i32 : i32, i32
  }
}

</mosaic_0001>

<bundles_post_ra>
// kernel: tpu_custom_call.1
= control target key start
LH: loop header
LB: loop body
LE: loop exit
PB: predicated region body
PF: predicated region fallthrough
CT: control target
= control target key end

     0   :  { %14 = vsyncpa [#allocation3], 0  ;;  %s746_s0 = inlined_call_operand.hbm [shape: bf16[8,32], index: 0, kind: input, shape index: {}]   ;;  %s747_s1 = inlined_call_operand.hbm [shape: bf16[8,32], index: 1, kind: input, shape index: {}]   ;;  %s748_s2 = inlined_call_operand.hbm [shape: bf16[32,128], index: 2, kind: input, shape index: {}]   ;;  %s749_s3 = inlined_call_operand.hbm [shape: bf16[32,128], index: 3, kind: input, shape index: {}]   ;;  %s750_s4 = inlined_call_operand.vmem [shape: f32[1,128], index: 4, kind: input, shape index: {}]   ;;  %s751_s5 = inlined_call_operand.hbm [shape: bf16[128,128], index: 5, kind: input, shape index: {}]   ;;  %s752_s6 = inlined_call_operand.vmem [shape: f32[1,128], index: 6, kind: input, shape index: {}]   ;;  %s753_s7 = inlined_call_operand.hbm [shape: bf16[128,128], index: 7, kind: input, shape index: {}]   ;;  %s754_s8 = inlined_call_operand.vmem [shape: f32[1,128], index: 8, kind: input, shape index: {}]   ;;  %s755_s9 = inlined_call_operand.vmem [shape: f32[8,2], index: 9, kind: output, shape index: {}]  }
   0x1   :  { %15 = vsyncpa [#allocation5], 0 }
   0x2   :  { %16 = vsyncpa [#allocation8], 0  ;;  %s34_s11 = sshll.u32 %s747_s1, 4  ;;  %s35_s11 = int_to_ptr.hbm [resolvable:$true] %s34_s11 }
   0x3   :  { %17 = vsyncpa [#allocation11], 0  ;;  %s658_s12 = smov [#allocation4]   ;;  %s57_s16 = sshll.u32 %s749_s3, 4  ;;  %s58_s16 = int_to_ptr.hbm [resolvable:$true] %s57_s16 }
   0x4   :  { %s36_s13 = sshll.u32 %s658_s12, 4  ;;  %s659_s17 = smov [#allocation7]   ;;  %s37_s13 = int_to_ptr.vmem [resolvable:$true] %s36_s13 }
   0x5   :  { %39 = dma.hbm_to_vmem [thread:$0]  %s35_s11, 64, %s37_s13, [#allocation5]  }
   0x6   :  { %s59_s18 = sshll.u32 %s659_s17, 4  ;;  %s23_s21 = sshll.u32 %s746_s0, 4  ;;  %s60_s18 = int_to_ptr.vmem [resolvable:$true] %s59_s18  ;;  %s24_s21 = int_to_ptr.hbm [resolvable:$true] %s23_s21 }
   0x7   :  { %s660_s1 = smov 64   ;;  %s661_s22 = smov 4  }
   0x8   :  { %65 = dma.hbm_to_vmem [thread:$0]  %s58_s16, 256, %s60_s18, [#allocation8], %s660_s1, %s660_s1, %s661_s22  }
   0x9   :  { %s44_s25 = sshll.u32 %s748_s2, 4  ;;  %s662_s26 = smov [#allocation2]   ;;  %s45_s25 = int_to_ptr.hbm [resolvable:$true] %s44_s25 }
   0xa   :  { %s25_s27 = sshll.u32 %s662_s26, 4  ;;  %s663_s3 = smov [#allocation6]   ;;  %s26_s27 = int_to_ptr.vmem [resolvable:$true] %s25_s27 }
   0xb   :  { %28 = dma.hbm_to_vmem [thread:$0]  %s24_s21, 64, %s26_s27, [#allocation3]  }
   0xc   :  { %s46_s28 = sshll.u32 %s663_s3, 4  ;;  %s72_s0 = sshll.u32 %s751_s5, 4  ;;  %s47_s28 = int_to_ptr.vmem [resolvable:$true] %s46_s28  ;;  %s73_s0 = int_to_ptr.hbm [resolvable:$true] %s72_s0 }
   0xd   :  { %52 = dma.hbm_to_vmem [thread:$0]  %s45_s25, 256, %s47_s28, [#allocation5], %s660_s1, %s660_s1, %s661_s22  }
   0xe   :  { %s87_s12 = sshll.u32 %s753_s7, 4  ;;  %s664_s13 = smov [#allocation9]   ;;  %s88_s12 = int_to_ptr.hbm [resolvable:$true] %s87_s12 }
   0xf   :  { %s74_s2 = sshll.u32 %s664_s13, 4  ;;  %s665_s14 = smov [#allocation10]   ;;  %s75_s2 = int_to_ptr.vmem [resolvable:$true] %s74_s2 }
  0x10   :  { %80 = dma.hbm_to_vmem [thread:$0]  %s73_s0, 1024, %s75_s2, [#allocation8], %s660_s1, %s660_s1, %s661_s22  }
  0x11   :  { %s89_s15 = sshll.u32 %s665_s14, 4  ;;  %s90_s15 = int_to_ptr.vmem [resolvable:$true] %s89_s15 }
  0x12   :  { %95 = dma.hbm_to_vmem [thread:$0]  %s88_s12, 1024, %s90_s15, [#allocation11], %s660_s1, %s660_s1, %s661_s22  }
  0x13   :  { %650 = dma.done.wait [#allocation3], 64  }
  0x14   :  { %651 = vsyncadd [#allocation3], 4294967232 }
  0x15   :  { %652 = dma.done.wait [#allocation5], 320  }
  0x16   :  { %653 = vsyncadd [#allocation5], 4294966976 }
  0x17   :  { %654 = dma.done.wait [#allocation8], 1280  }
  0x18   :  { %655 = vsyncadd [#allocation8], 4294966016 }
  0x19   :  { %656 = dma.done.wait [#allocation11], 1024  }
  0x1a   :  { %657 = vsyncadd [#allocation11], 4294966272  ;;  %v474_v0 = vld [vmem:[#allocation7 + $0x8] sm:$0xff]  ;;  %v472_v1 = vld [vmem:[#allocation6 + $0x8] sm:$0xff]  ;;  %vm145_vm0 = vcmask 261120   ;;  %v366_v40 = vlaneseq  ;;  %vm379_vm4 = vcmask 15360  }
  0x1b   :  { %155 = vmatpush.bf16.msra.mxu0 %v474_v0  ;;  %183 = vmatpush.bf16.msra.mxu1 %v472_v1  ;;  %v473_v2 = vld [vmem:[#allocation7] sm:$0xff]  ;;  %v471_v3 = vld [vmem:[#allocation6] sm:$0xff]  ;;  %v482_v4 = vld [vmem:[#allocation9 + $0x38] sm:$0xff] }
  0x1c   :  { %v481_v5 = vld [vmem:[#allocation9 + $0x30] sm:$0xff]  ;;  %267 = vmatpush.bf16.msra.mxu2 %v482_v4  ;;  %v128_v6 = vld [vmem:[#allocation4] sm:$0xf]  ;;  %v123_v7 = vld [vmem:[#allocation2] sm:$0xf]  ;;  %v367_v41 = vand.u32 127, %v366_v40 }
  0x1d   :  { %v480_v8 = vld [vmem:[#allocation9 + $0x28] sm:$0xff]  ;;  %v479_v9 = vld [vmem:[#allocation9 + $0x20] sm:$0xff]  ;;  %v478_v10 = vld [vmem:[#allocation9 + $0x18] sm:$0xff] }
  0x1e   :  { %v477_v11 = vld [vmem:[#allocation9 + $0x10] sm:$0xff]  ;;  %v476_v12 = vld [vmem:[#allocation9 + $0x8] sm:$0xff]  ;;  %v475_v13 = vld [vmem:[#allocation9] sm:$0xff]  ;;  %vm368_vm3 = vcmp.lt.s32.totalorder %v367_v41, 2 }
  0x1f   :  { %156 = vmatpush.bf16.msra.mxu0 %v473_v2  ;;  %184 = vmatpush.bf16.msra.mxu1 %v471_v3  ;;  %v490_v14 = vld [vmem:[#allocation10 + $0x38] sm:$0xff]  ;;  %v489_v15 = vld [vmem:[#allocation10 + $0x30] sm:$0xff]  ;;  %v488_v16 = vld [vmem:[#allocation10 + $0x28] sm:$0xff] }
  0x20   :  { %268 = vmatpush.bf16.msra.mxu2 %v481_v5  ;;  %353 = vmatpush.bf16.msra.mxu3 %v490_v14  ;;  %v487_v17 = vld [vmem:[#allocation10 + $0x20] sm:$0xff]  ;;  %v486_v18 = vld [vmem:[#allocation10 + $0x18] sm:$0xff]  ;;  %v485_v19 = vld [vmem:[#allocation10 + $0x10] sm:$0xff] }
  0x21   :  { %v499_v20 = vld [vmem:[%s750_s4] ss:$0 sm:$0xff]  ;;  %v484_v30 = vld [vmem:[#allocation10 + $0x8] sm:$0xff]  ;;  %v483_v31 = vld [vmem:[#allocation10] sm:$0xff] }
  0x22   :  { %397 = vmatmul.msk.bf16.vlgmr.msra.gmra.mxu0 %vm145_vm0, %v128_v6  ;;  %406 = vmatmul.msk.bf16.vlgmr.msra.gmra.mxu1 %vm145_vm0, %v123_v7  ;;  %v500_v32 = vld [vmem:[%s752_s6] ss:$0 sm:$0xff] }
  0x23   :  { %v501_v42 = vld [vmem:[%s754_s8] ss:$0 sm:$0xff] }
  0x24   :  { %269 = vmatpush.bf16.msra.mxu2 %v480_v8  ;;  %354 = vmatpush.bf16.msra.mxu3 %v489_v15 }
  0x28   :  { %270 = vmatpush.bf16.msra.mxu2 %v479_v9  ;;  %355 = vmatpush.bf16.msra.mxu3 %v488_v16 }
  0x2c   :  { %271 = vmatpush.bf16.msra.mxu2 %v478_v10  ;;  %356 = vmatpush.bf16.msra.mxu3 %v487_v17 }
  0x30   :  { %272 = vmatpush.bf16.msra.mxu2 %v477_v11  ;;  %357 = vmatpush.bf16.msra.mxu3 %v486_v18 }
  0x34   :  { %273 = vmatpush.bf16.msra.mxu2 %v476_v12  ;;  %358 = vmatpush.bf16.msra.mxu3 %v485_v19 }
  0x38   :  { %274 = vmatpush.bf16.msra.mxu2 %v475_v13  ;;  %359 = vmatpush.bf16.msra.mxu3 %v484_v30 }
  0x3c   :  { %360 = vmatpush.bf16.msra.mxu3 %v483_v31 }
  0x9f   :  { %v158_v21 = vpop.f32.mrf.mxu0  ;;  %v186_v22 = vpop.f32.mrf.mxu1 }
  0xa0   :  { %v187_v23 = vadd.f32 %v186_v22, %v158_v21 }
  0xa2   :  { %v194_v24 = vadd.f32 %v499_v20, %v187_v23 }
  0xa4   :  { %vm195_vm1 = vcmp.gt.f32.partialorder %v194_v24, 0.0  ;;  %v196_v25 = vmul.f32 0.01, %v194_v24 }
  0xa6   :  { %v197_v26 = vsel %vm195_vm1, %v194_v24, %v196_v25 }
  0xa7   :  { %v160_v27 = vpop.f32.mrf.mxu0  ;;  %v188_v28 = vpop.f32.mrf.mxu1  ;;  %v198_v29 = vpack.c.bf16 %v197_v26, %v197_v26 }
  0xa9   :  { %275 = vmatmul.bf16.vlgmr.msra.gmra.mxu2 %v198_v29 }
 0x12c   :  { %v276_v33 = vpop.f32.mrf.mxu2 }
 0x12d   :  { %v277_v34 = vadd.f32 %v500_v32, %v276_v33 }
 0x12f   :  { %vm280_vm2 = vcmp.gt.f32.partialorder %v277_v34, 0.0  ;;  %v281_v35 = vmul.f32 0.01, %v277_v34 }
 0x131   :  { %v282_v36 = vsel %vm280_vm2, %v277_v34, %v281_v35 }
 0x132   :  { %v283_v37 = vadd.f32 %v282_v36, %v197_v26 }
 0x134   :  { %v278_v38 = vpop.f32.mrf.mxu2  ;;  %v284_v39 = vpack.c.bf16 %v283_v37, %v283_v37 }
 0x136   :  { %361 = vmatmul.bf16.vlgmr.msra.gmra.mxu3 %v284_v39 }
 0x1b9   :  { %v362_v43 = vpop.f32.mrf.mxu3 }
 0x1ba   :  { %v363_v44 = vadd.f32 %v501_v42, %v362_v43 }
 0x1bc   :  { %v369_v45 = vsel %vm368_vm3, %v363_v44, -1e+30 }
 0x1bd   :  { %370 = vmax.xlane.f32.xlu0 %v369_v45 }
 0x1c1   :  { %v364_v46 = vpop.f32.mrf.mxu3 }
 0x230   :  { %v371_v47 = vpop.xlane.xlu0 %370 }
 0x231   :  { %v372_v48 = vsub.f32 %v369_v45, %v371_v47 }
 0x233   :  { %v373_v49 = vmul.f32 1.442695, %v372_v48 }
 0x235   :  { %502 = vpow2.f32 %v373_v49 }
 0x23b   :  { %v503_v50 = vpop.eup %502 }
 0x23c   :  { %375 = vadd.xlane.f32.xlu0 %v503_v50 }
 0x2af   :  { %v376_v51 = vpop.xlane.xlu0 %375 }
 0x2b0   :  { %504 = vrcp.f32 %v376_v51 }
 0x2b6   :  { %v505_v52 = vpop.eup %504 }
 0x2b7   :  { %v378_v53 = vmul.f32 %v505_v52, %v503_v50 }
 0x2b9   :  { %380 = vst.msk [vmem:[%s755_s9] sm:$0xff] %vm379_vm4, %v378_v53 }
 0x2ba   :  { %385 = vsyncpa [#allocation3], 1 }
 0x2bb   :  { %386 = vsyncpa [#allocation5], 1 }
 0x2bc   :  { %387 = vsyncpa [#allocation8], 1 }
 0x2bd   :  { %388 = vsyncpa [#allocation11], 1 }

</bundles_post_ra>
